<compile_context>
chip_gen: v6e
topology: v6e:2x2x1
jax: 0.10.0
libtpu: 0.0.40
codegen_flags: <defaults>
</compile_context>

<pallas_src>
import functools

import jax
import jax.numpy as jnp
from jax.experimental import pallas as pl
from jax.experimental.pallas import tpu as pltpu

# NOTE: plain Python floats only.  Module-level jnp.float32(...) scalars become concrete
# arrays that the kernel tracer captures as constants, and pallas_call rejects that
# ("captures constants ... pass them as inputs") -- this was the previous compile failure.
_NEG_BIG = -1e30                 # finite "masked" logit; avoids -inf - -inf = nan paths
_LEAKY_SLOPE = 0.2
_INV_SQRT2 = 0.7071067811865476


def _erf(x):
    # Abramowitz & Stegun 7.1.26, |err| <= 1.5e-7: exact-GELU-quality erf from exp/div/select
    # only (no reliance on an erf lowering rule in Mosaic).
    t = 1.0 / (1.0 + 0.3275911 * jnp.abs(x))
    poly = t * (0.254829592 + t * (-0.284496736 + t * (1.421413741
               + t * (-1.453152027 + t * 1.061405429))))
    y = 1.0 - poly * jnp.exp(-x * x)
    return jnp.where(x >= 0.0, y, -y)


def _ln_proj_kernel(x_ref, ln_w_ref, ln_b_ref, w_lr_ref, b_lr_ref, proj_ref):
    x = x_ref[...].astype(jnp.float32)                              # (TN, D)

    # pyg LayerNorm(mode='node'): per-node mean/var over features (unbiased=False)
    mean = jnp.mean(x, axis=-1, keepdims=True)
    var = jnp.mean((x - mean) ** 2, axis=-1, keepdims=True)
    xn = (x - mean) * jax.lax.rsqrt(var + 1e-5)
    xn = xn * ln_w_ref[...] + ln_b_ref[...]                         # ln_w/ln_b: (1, D)

    # fused [lin_l | lin_r] projection: one (D, 2*H*D) bf16 MXU matmul; single lane-dense store.
    proj = jnp.dot(xn.astype(jnp.bfloat16), w_lr_ref[...],
                   preferred_element_type=jnp.float32) + b_lr_ref[...]
    proj_ref[...] = proj.astype(proj_ref.dtype)


def _gat_attn_kernel(nnz_ref, adj_ref, dst_ref, src_ref, att_ref, bias_ref, out_ref,
                     m_sc, l_sc, acc_sc, *, heads, dim):
    i = pl.program_id(0)                       # destination-node tile
    j = pl.program_id(1)                       # source-node tile (online-softmax reduction axis)

    @pl.when(j == 0)
    def _init():
        m_sc[...] = jnp.full(m_sc.shape, _NEG_BIG, jnp.float32)
        l_sc[...] = jnp.zeros(l_sc.shape, jnp.float32)
        acc_sc[...] = jnp.zeros(acc_sc.shape, jnp.float32)

    # Adjacency-tile sparsity skipping: per-tile edge counts were scalar-prefetched into SMEM;
    # a fully-empty (dst, src) tile contributes nothing (p == 0, m unchanged), so skip it.
    @pl.when(nnz_ref[i, j] > 0)
    def _compute():
        mask = adj_ref[...] != 0                                    # (TD, TS) rows=dst, cols=src
        src = src_ref[...]                                          # (TS, 2*H*D) bf16
        dst = dst_ref[...]                                          # (TD, 2*H*D) bf16

        for h in range(heads):                                      # static unrolled head loop
            xl_h = src[:, h * dim:(h + 1) * dim]                    # (TS, D) bf16 lin_l (sources)
            xr_h = dst[:, (heads + h) * dim:(heads + h + 1) * dim]  # (TD, D) bf16 lin_r (targets)
            xr_f = xr_h.astype(jnp.float32)
            xl_t = xl_h.astype(jnp.float32).T                       # (D, TS): one transpose / head

            # GATv2 logits, lane-dense: s[i,j] = sum_d att[h,d] * leaky_relu(xr[i,d] + xl[j,d])
            # built as D rank-1 updates on (TD, TS) f32 slabs; att[h,d] is a cheap SMEM scalar.
            # (Never materializes the (TD, TS, D) broadcast -> no vreg spill.)
            s = jnp.zeros(mask.shape, jnp.float32)
            for dd in range(dim):
                e = xr_f[:, dd:dd + 1] + xl_t[dd:dd + 1, :]         # (TD, 1) + (1, TS) -> (TD, TS)
                e = jnp.where(e > 0.0, e, _LEAKY_SLOPE * e)
                s = s + att_ref[h, dd] * e
            # TODO(synk): on v6e/v7x the add/leaky/exp above could run in bf16 (bf16 VALU+EUP,
            # ~2x throughput); kept f32 so v5e (no bf16 VPU/EUP) stays on one code path.
            s = jnp.where(mask, s, _NEG_BIG)

            # ---- online (flash-style) softmax over source tiles ----
            m_prev = m_sc[h]                                        # (TD, 1)
            m_new = jnp.maximum(m_prev, jnp.max(s, axis=-1, keepdims=True))
            rescale = jnp.exp(m_prev - m_new)
            p = jnp.where(mask, jnp.exp(s - m_new), 0.0)            # (TD, TS)
            l_sc[h] = rescale * l_sc[h] + jnp.sum(p, axis=-1, keepdims=True)
            acc_sc[h] = rescale * acc_sc[h] + jnp.dot(
                p.astype(jnp.bfloat16), xl_h, preferred_element_type=jnp.float32)
            m_sc[h] = m_new

    @pl.when(j == pl.num_programs(1) - 1)
    def _finalize():
        # exact divide (runs once per dst tile); max() guards isolated rows (no edge/self-loop).
        out = acc_sc[0] / jnp.maximum(l_sc[0], 1e-30)
        for h in range(1, heads):
            out = out + acc_sc[h] / jnp.maximum(l_sc[h], 1e-30)
        out = out * (1.0 / heads) + bias_ref[...]                   # concat=False -> head mean + bias
        out = 0.5 * out * (1.0 + _erf(out * _INV_SQRT2))            # exact (erf) GELU; dropout = id
        out_ref[...] = out.astype(out_ref.dtype)


def _pick_tile(n, target, quantum=8):
    """Largest divisor of n that is a multiple of `quantum` and <= target (n itself when small)."""
    if n <= target:
        return n
    t = (target // quantum) * quantum
    while t >= quantum:
        if n % t == 0:
            return t
        t -= quantum
    # TODO(synk): awkward N (e.g. large prime) falls back to a whole-axis tile; pad N upstream
    # if that blows the VMEM budget.
    return n


def gnn_layer_forward(x, adj, params, *, heads, tn=None, td=None, ts=None):
    """LayerNorm(node) -> GATv2Conv(dim, dim, heads, concat=False) -> GELU -> Dropout(eval)."""
    n, d = x.shape
    hd = heads * d

    # fused projection weight/bias [lin_l | lin_r]; bf16 weights for the MXU.
    w_lr = jnp.concatenate([params["w_l"], params["w_r"]], axis=1).astype(jnp.bfloat16)
    b_lr = jnp.concatenate([params["b_l"], params["b_r"]], axis=1).astype(jnp.float32)
    # adj is the only O(N^2) operand: ship it as an int8 mask (4x less HBM/VMEM than f32).
    # TODO(synk): for HBM-bound v5e cases, bit-pack adj to 1 bit/edge for another 8x.
    adj_i8 = (adj != 0).astype(jnp.int8)

    # Tile picks (always divisors of n).  The adj lane (src) dim must be a multiple of 128 or
    # the full axis; the per-step working set after the rank-1 restructure is only a few MiB,
    # so these targets fit v7x's 64 MiB VMEM and can be grown on v5e/v6e (128 MiB).
    if tn is None:
        tn = _pick_tile(n, 512, 8)
    if ts is None:
        ts = _pick_tile(n, 512, 128)
    if td is None:
        td = _pick_tile(n, 256, 8)
        if td == n and n >= 128 and n % 16 == 0:
            td = n // 2          # >= 2 dst tiles so the "parallel" axis can feed both v7x TCs

    n_dst, n_src = n // td, n // ts

    # per-(dst-tile, src-tile) edge counts -> SMEM scalar prefetch (adjacency-tile skipping).
    tile_nnz = jnp.sum(adj_i8.astype(jnp.int32).reshape(n_dst, td, n_src, ts), axis=(1, 3))

    # ---- stage 1: node-tiled LayerNorm + fused GATv2 projection, lane-dense (N, 2*H*D) bf16 ----
    proj = pl.pallas_call(
        _ln_proj_kernel,
        out_shape=jax.ShapeDtypeStruct((n, 2 * hd), jnp.bfloat16),
        grid_spec=pltpu.PrefetchScalarGridSpec(
            num_scalar_prefetch=0,
            grid=(n // tn,),
            in_specs=[
                pl.BlockSpec((tn, d), lambda i: (i, 0)),            # x
                pl.BlockSpec((1, d), lambda i: (0, 0)),             # ln_w
                pl.BlockSpec((1, d), lambda i: (0, 0)),             # ln_b
                pl.BlockSpec((d, 2 * hd), lambda i: (0, 0)),        # [w_l | w_r] bf16
                pl.BlockSpec((1, 2 * hd), lambda i: (0, 0)),        # [b_l | b_r]
            ],
            out_specs=pl.BlockSpec((tn, 2 * hd), lambda i: (i, 0)),
        ),
        compiler_params=pltpu.CompilerParams(dimension_semantics=("parallel",)),
    )(x, params["ln_w"], params["ln_b"], w_lr, b_lr)

    # ---- stage 2: tiled GATv2 attention, online softmax over source tiles ----
    attn = functools.partial(_gat_attn_kernel, heads=heads, dim=d)
    out = pl.pallas_call(
        attn,
        out_shape=jax.ShapeDtypeStruct((n, d), x.dtype),
        grid_spec=pltpu.PrefetchScalarGridSpec(
            num_scalar_prefetch=1,                                  # tile_nnz -> SMEM
            grid=(n_dst, n_src),                                    # src (reduction) axis last
            in_specs=[
                pl.BlockSpec((td, ts), lambda i, j, nnz: (i, j)),         # adj mask (int8)
                pl.BlockSpec((td, 2 * hd), lambda i, j, nnz: (i, 0)),     # proj rows of dst nodes
                pl.BlockSpec((ts, 2 * hd), lambda i, j, nnz: (j, 0)),     # proj rows of src nodes
                pl.BlockSpec(memory_space=pltpu.MemorySpace.SMEM),        # att: per-d scalar reads
                pl.BlockSpec((1, d), lambda i, j, nnz: (0, 0)),           # bias
            ],
            out_specs=pl.BlockSpec((td, d), lambda i, j, nnz: (i, 0)),
            scratch_shapes=[
                pltpu.VMEM((heads, td, 1), jnp.float32),    # running max
                pltpu.VMEM((heads, td, 1), jnp.float32),    # running sum
                pltpu.VMEM((heads, td, d), jnp.float32),    # per-head accumulator
            ],
        ),
        compiler_params=pltpu.CompilerParams(
            dimension_semantics=("parallel", "arbitrary"),          # dst across TCs; src = reduction
        ),
    )(tile_nnz, adj_i8, proj, proj, params["att"].astype(jnp.float32), params["bias"])
    return out


def gnn_layer_reference(x, adj, params, *, heads):
    """Pure-JAX f32 reference of the same math (for validation)."""
    d = x.shape[-1]
    mean = jnp.mean(x, axis=-1, keepdims=True)
    var = jnp.mean((x - mean) ** 2, axis=-1, keepdims=True)
    xn = (x - mean) / jnp.sqrt(var + 1e-5) * params["ln_w"] + params["ln_b"]
    xl = xn @ params["w_l"] + params["b_l"]
    xr = xn @ params["w_r"] + params["b_r"]
    acc = jnp.zeros_like(x)
    for h in range(heads):
        xl_h = xl[:, h * d:(h + 1) * d]
        xr_h = xr[:, h * d:(h + 1) * d]
        e = xr_h[:, None, :] + xl_h[None, :, :]
        e = jnp.where(e > 0, e, 0.2 * e)
        s = jnp.sum(e * params["att"][h][None, None, :], axis=-1)
        s = jnp.where(adj != 0, s, -1e30)
        s = s - jnp.max(s, axis=-1, keepdims=True)
        p = jnp.where(adj != 0, jnp.exp(s), 0.0)
        alpha = p / jnp.sum(p, axis=-1, keepdims=True)
        acc = acc + alpha @ xl_h
    out = acc / heads + params["bias"]
    return 0.5 * out * (1.0 + jax.lax.erf(out / jnp.sqrt(2.0)))


if __name__ == "__main__":
    N, D, HEADS, E = 256, 32, 2, 1024

    key = jax.random.PRNGKey(0)
    keys = jax.random.split(key, 8)

    x = jax.random.normal(keys[0], (N, D), dtype=jnp.float32)

    # deterministic random edge_index (2, E): row 0 = src, row 1 = dst
    src = jax.random.randint(keys[1], (E,), 0, N)
    dst = jax.random.randint(keys[2], (E,), 0, N)
    edge_index = jnp.stack([src, dst], axis=0)

    # dense adjacency mask (rows = dst, cols = src) + self loops (PyG add_self_loops default).
    # TODO(synk): dense binary mask collapses duplicate edges; PyG softmax would count them twice.
    adj = jnp.zeros((N, N), jnp.float32).at[edge_index[1], edge_index[0]].set(1.0)
    adj = adj.at[jnp.arange(N), jnp.arange(N)].set(1.0)

    scale = 0.1
    params = {
        "ln_w": jnp.ones((1, D), jnp.float32),
        "ln_b": jnp.zeros((1, D), jnp.float32),
        "w_l": scale * jax.random.normal(keys[3], (D, HEADS * D), jnp.float32),
        "b_l": scale * jax.random.normal(keys[4], (1, HEADS * D), jnp.float32),
        "w_r": scale * jax.random.normal(keys[5], (D, HEADS * D), jnp.float32),
        "b_r": scale * jax.random.normal(keys[6], (1, HEADS * D), jnp.float32),
        "att": scale * jax.random.normal(keys[7], (HEADS, D), jnp.float32),
        "bias": jnp.zeros((1, D), jnp.float32),
    }

    # explicit small tiles so the test exercises the (dst, src) grid, the online softmax across
    # multiple source tiles, and the nnz-based adjacency-tile skipping (grid = (4, 2)).
    out = gnn_layer_forward(x, adj, params, heads=HEADS, td=64, ts=128)
    out = jax.block_until_ready(out)

    ref = gnn_layer_reference(x, adj, params, heads=HEADS)
    assert out.shape == (N, D)
    # tolerance covers the intentional bf16 MXU inputs (proj, p) in the kernel
    assert jnp.allclose(out, ref, atol=3e-2, rtol=3e-2), float(jnp.max(jnp.abs(out - ref)))

    print("KERNEL_OK")
</pallas_src>

<mosaic_0001>
module attributes {stable_mosaic.version = 11 : i64} {
  func.func @_ln_proj_kernel(%arg0: i32, %arg1: memref<256x32xf32, #tpu.memory_space<vmem>>, %arg2: memref<1x32xf32, #tpu.memory_space<vmem>>, %arg3: memref<1x32xf32, #tpu.memory_space<vmem>>, %arg4: memref<32x128xbf16, #tpu.memory_space<vmem>>, %arg5: memref<1x128xf32, #tpu.memory_space<vmem>>, %arg6: memref<256x128xbf16, #tpu.memory_space<vmem>>) attributes {dimension_semantics = [#tpu.dimension_semantics<parallel>], iteration_bounds = array<i64: 1>, scalar_prefetch = 0 : i64, scratch_operands = 0 : i64, tpu.core_type = #tpu.core_type<tc>, window_params = [{transform_indices = @transform_0, window_bounds = array<i64: 256, 32>}, {pipeline_mode = #tpu.pipeline_mode<synchronous>, transform_indices = @transform_1, window_bounds = array<i64: 1, 32>}, {pipeline_mode = #tpu.pipeline_mode<synchronous>, transform_indices = @transform_2, window_bounds = array<i64: 1, 32>}, {pipeline_mode = #tpu.pipeline_mode<synchronous>, transform_indices = @transform_3, window_bounds = array<i64: 32, 128>}, {pipeline_mode = #tpu.pipeline_mode<synchronous>, transform_indices = @transform_4, window_bounds = array<i64: 1, 128>}, {transform_indices = @transform_5, window_bounds = array<i64: 256, 128>}]} {
    %c0 = arith.constant 0 : index
    %c0_0 = arith.constant 0 : index
    %0 = vector.load %arg1[%c0, %c0_0] : memref<256x32xf32, #tpu.memory_space<vmem>>, vector<256x32xf32>
    %cst = arith.constant dense<0.000000e+00> : vector<256xf32>
    %1 = vector.multi_reduction <add>, %0, %cst [1] : vector<256x32xf32> to vector<256xf32>
    %2 = vector.shape_cast %1 : vector<256xf32> to vector<256x1xf32>
    %cst_1 = arith.constant 3.200000e+01 : f32
    %3 = vector.broadcast %cst_1 : f32 to vector<256x1xf32>
    %4 = arith.divf %2, %3 : vector<256x1xf32>
    %5 = vector.broadcast %4 : vector<256x1xf32> to vector<256x32xf32>
    %6 = arith.subf %0, %5 : vector<256x32xf32>
    %7 = arith.mulf %6, %6 : vector<256x32xf32>
    %cst_2 = arith.constant dense<0.000000e+00> : vector<256xf32>
    %8 = vector.multi_reduction <add>, %7, %cst_2 [1] : vector<256x32xf32> to vector<256xf32>
    %9 = vector.shape_cast %8 : vector<256xf32> to vector<256x1xf32>
    %cst_3 = arith.constant 3.200000e+01 : f32
    %10 = vector.broadcast %cst_3 : f32 to vector<256x1xf32>
    %11 = arith.divf %9, %10 : vector<256x1xf32>
    %12 = vector.broadcast %4 : vector<256x1xf32> to vector<256x32xf32>
    %13 = arith.subf %0, %12 : vector<256x32xf32>
    %cst_4 = arith.constant 9.99999974E-6 : f32
    %14 = vector.broadcast %cst_4 : f32 to vector<256x1xf32>
    %15 = arith.addf %11, %14 : vector<256x1xf32>
    %16 = math.rsqrt %15 : vector<256x1xf32>
    %17 = vector.broadcast %16 : vector<256x1xf32> to vector<256x32xf32>
    %18 = arith.mulf %13, %17 : vector<256x32xf32>
    %c0_5 = arith.constant 0 : index
    %c0_6 = arith.constant 0 : index
    %19 = vector.load %arg2[%c0_5, %c0_6] : memref<1x32xf32, #tpu.memory_space<vmem>>, vector<1x32xf32>
    %20 = vector.broadcast %19 : vector<1x32xf32> to vector<256x32xf32>
    %21 = arith.mulf %18, %20 : vector<256x32xf32>
    %c0_7 = arith.constant 0 : index
    %c0_8 = arith.constant 0 : index
    %22 = vector.load %arg3[%c0_7, %c0_8] : memref<1x32xf32, #tpu.memory_space<vmem>>, vector<1x32xf32>
    %23 = vector.broadcast %22 : vector<1x32xf32> to vector<256x32xf32>
    %24 = arith.addf %21, %23 : vector<256x32xf32>
    %25 = arith.truncf %24 : vector<256x32xf32> to vector<256x32xbf16>
    %c0_9 = arith.constant 0 : index
    %c0_10 = arith.constant 0 : index
    %26 = vector.load %arg4[%c0_9, %c0_10] : memref<32x128xbf16, #tpu.memory_space<vmem>>, vector<32x128xbf16>
    %cst_11 = arith.constant dense<0.000000e+00> : vector<256x128xf32>
    %27 = tpu.matmul %25, %26, %cst_11 {dimension_numbers = #tpu.dot_dimension_numbers<[1], [0], [0], [1], [0, 0, 1, 1], [], []>} : vector<256x32xbf16>, vector<32x128xbf16>, vector<256x128xf32> -> vector<256x128xf32>
    %c0_12 = arith.constant 0 : index
    %c0_13 = arith.constant 0 : index
    %28 = vector.load %arg5[%c0_12, %c0_13] : memref<1x128xf32, #tpu.memory_space<vmem>>, vector<1x128xf32>
    %29 = vector.broadcast %28 : vector<1x128xf32> to vector<256x128xf32>
    %30 = arith.addf %27, %29 : vector<256x128xf32>
    %31 = arith.truncf %30 : vector<256x128xf32> to vector<256x128xbf16>
    %c0_14 = arith.constant 0 : index
    %c0_15 = arith.constant 0 : index
    %32 = vector.load %arg6[%c0_14, %c0_15] : memref<256x128xbf16, #tpu.memory_space<vmem>>, vector<256x128xbf16>
    tpu.vector_store %arg6[%c0_14, %c0_15], %31 {strides = array<i32>} : memref<256x128xbf16, #tpu.memory_space<vmem>>, vector<256x128xbf16>,
    return
  }
  func.func @transform_0(%arg0: i32) -> (i32, i32) {
    %c0_i32 = arith.constant 0 : i32
    %c0_i32_0 = arith.constant 0 : i32
    return %arg0, %c0_i32 : i32, i32
  }
  func.func @transform_1(%arg0: i32) -> (i32, i32) {
    %c0_i32 = arith.constant 0 : i32
    %c0_i32_0 = arith.constant 0 : i32
    %c0_i32_1 = arith.constant 0 : i32
    return %c0_i32, %c0_i32_0 : i32, i32
  }
  func.func @transform_2(%arg0: i32) -> (i32, i32) {
    %c0_i32 = arith.constant 0 : i32
    %c0_i32_0 = arith.constant 0 : i32
    %c0_i32_1 = arith.constant 0 : i32
    return %c0_i32, %c0_i32_0 : i32, i32
  }
  func.func @transform_3(%arg0: i32) -> (i32, i32) {
    %c0_i32 = arith.constant 0 : i32
    %c0_i32_0 = arith.constant 0 : i32
    %c0_i32_1 = arith.constant 0 : i32
    return %c0_i32, %c0_i32_0 : i32, i32
  }
  func.func @transform_4(%arg0: i32) -> (i32, i32) {
    %c0_i32 = arith.constant 0 : i32
    %c0_i32_0 = arith.constant 0 : i32
    %c0_i32_1 = arith.constant 0 : i32
    return %c0_i32, %c0_i32_0 : i32, i32
  }
  func.func @transform_5(%arg0: i32) -> (i32, i32) {
    %c0_i32 = arith.constant 0 : i32
    %c0_i32_0 = arith.constant 0 : i32
    return %arg0, %c0_i32 : i32, i32
  }
}

</mosaic_0001>

<bundles_post_ra>
// kernel: tpu_custom_call.1
= control target key start
LH: loop header
LB: loop body
LE: loop exit
PB: predicated region body
PF: predicated region fallthrough
CT: control target
= control target key end

     0   :  { %vm54_vm0 = vcmask 261120   ;;  %s1920_s0 = inlined_call_operand.vmem [shape: f32[256,32], index: 0, kind: input, shape index: {}]   ;;  %s1921_s1 = inlined_call_operand.vmem [shape: f32[1,32], index: 1, kind: input, shape index: {}]   ;;  %s1922_s2 = inlined_call_operand.vmem [shape: f32[1,32], index: 2, kind: input, shape index: {}]   ;;  %s1923_s3 = inlined_call_operand.vmem [shape: bf16[32,128], index: 3, kind: input, shape index: {}]   ;;  %s1924_s4 = inlined_call_operand.vmem [shape: f32[1,128], index: 4, kind: input, shape index: {}]   ;;  %s1925_s5 = inlined_call_operand.hbm [shape: bf16[256,128], index: 5, kind: output, shape index: {}]  }
   0x1   :  { %v1339_v0 = vld [vmem:[%s1920_s0] sm:$0xff]  ;;  %v1349_v2 = vld [vmem:[%s1920_s0 + $0x8] sm:$0xff]  ;;  %v1367_v8 = vld [vmem:[%s1920_s0 + $0x10] sm:$0xff] }
   0x2   :  { %v1344_v1 = vld [vmem:[%s1920_s0 + $0x80] sm:$0xff]  ;;  %v55_v3 = vsel %vm54_vm0, %v1339_v0, 0.0  ;;  %v1358_v5 = vld [vmem:[%s1920_s0 + $0x88] sm:$0xff]  ;;  %v58_v6 = vsel %vm54_vm0, %v1349_v2, 0.0  ;;  %v1372_v9 = vld [vmem:[%s1920_s0 + $0x18] sm:$0xff]  ;;  %v61_v10 = vsel %vm54_vm0, %v1367_v8, 0.0 }
   0x3   :  { %v103_v4 = vsel %vm54_vm0, %v1344_v1, 0.0  ;;  %56 = vadd.xlane.f32.xlu0 %v55_v3  ;;  %v106_v7 = vsel %vm54_vm0, %v1358_v5, 0.0  ;;  %v64_v11 = vsel %vm54_vm0, %v1372_v9, 0.0  ;;  %v1381_v12 = vld [vmem:[%s1920_s0 + $0x90] sm:$0xff]  ;;  %v1386_v13 = vld [vmem:[%s1920_s0 + $0x98] sm:$0xff]  ;;  %v1393_v15 = vld [vmem:[%s1920_s0 + $0x20] sm:$0xff] }
   0x4   :  { %104 = vadd.xlane.f32.xlu1 %v103_v4  ;;  %v109_v14 = vsel %vm54_vm0, %v1381_v12, 0.0  ;;  %v112_v16 = vsel %vm54_vm0, %v1386_v13, 0.0  ;;  %v1400_v17 = vld [vmem:[%s1920_s0 + $0x28] sm:$0xff] }
   0x7   :  { %59 = vadd.xlane.f32.xlu0 %v58_v6 }
   0x8   :  { %107 = vadd.xlane.f32.xlu1 %v106_v7 }
   0xb   :  { %62 = vadd.xlane.f32.xlu0 %v61_v10 }
   0xc   :  { %65 = vadd.xlane.f32.xlu1 %v64_v11 }
   0xd   :  { %10 = vsyncpa [#allocation3], 0  ;;  %v67_v18 = vsel %vm54_vm0, %v1393_v15, 0.0  ;;  %v70_v19 = vsel %vm54_vm0, %v1400_v17, 0.0  ;;  %v1409_v20 = vld [vmem:[%s1920_s0 + $0xa0] sm:$0xff]  ;;  %v1414_v21 = vld [vmem:[%s1920_s0 + $0xa8] sm:$0xff] }
   0xe   :  { %v115_v22 = vsel %vm54_vm0, %v1409_v20, 0.0  ;;  %v118_v23 = vsel %vm54_vm0, %v1414_v21, 0.0  ;;  %v1423_v24 = vld [vmem:[%s1920_s0 + $0x30] sm:$0xff]  ;;  %v1428_v25 = vld [vmem:[%s1920_s0 + $0x38] sm:$0xff]  ;;  %v1451_v32 = vld [vmem:[%s1920_s0 + $0x40] sm:$0xff] }
   0xf   :  { %110 = vadd.xlane.f32.xlu0 %v109_v14  ;;  %v73_v26 = vsel %vm54_vm0, %v1423_v24, 0.0  ;;  %v76_v27 = vsel %vm54_vm0, %v1428_v25, 0.0  ;;  %v1437_v28 = vld [vmem:[%s1920_s0 + $0xb0] sm:$0xff]  ;;  %v1442_v29 = vld [vmem:[%s1920_s0 + $0xb8] sm:$0xff]  ;;  %v1456_v33 = vld [vmem:[%s1920_s0 + $0x48] sm:$0xff]  ;;  %v79_v34 = vsel %vm54_vm0, %v1451_v32, 0.0 }
  0x10   :  { %113 = vadd.xlane.f32.xlu1 %v112_v16  ;;  %v121_v30 = vsel %vm54_vm0, %v1437_v28, 0.0  ;;  %v124_v31 = vsel %vm54_vm0, %v1442_v29, 0.0  ;;  %v82_v35 = vsel %vm54_vm0, %v1456_v33, 0.0  ;;  %v1465_v36 = vld [vmem:[%s1920_s0 + $0xc0] sm:$0xff]  ;;  %v1470_v37 = vld [vmem:[%s1920_s0 + $0xc8] sm:$0xff]  ;;  %v1479_v40 = vld [vmem:[%s1920_s0 + $0x50] sm:$0xff] }
  0x11   :  { %v127_v38 = vsel %vm54_vm0, %v1465_v36, 0.0  ;;  %v130_v39 = vsel %vm54_vm0, %v1470_v37, 0.0  ;;  %v1484_v41 = vld [vmem:[%s1920_s0 + $0x58] sm:$0xff]  ;;  %v85_v42 = vsel %vm54_vm0, %v1479_v40, 0.0  ;;  %v1493_v44 = vld [vmem:[%s1920_s0 + $0xd0] sm:$0xff]  ;;  %v1507_v48 = vld [vmem:[%s1920_s0 + $0x60] sm:$0xff] }
  0x12   :  { %v88_v43 = vsel %vm54_vm0, %v1484_v41, 0.0  ;;  %v1498_v45 = vld [vmem:[%s1920_s0 + $0xd8] sm:$0xff]  ;;  %v133_v46 = vsel %vm54_vm0, %v1493_v44, 0.0  ;;  %v1512_v49 = vld [vmem:[%s1920_s0 + $0x68] sm:$0xff]  ;;  %v91_v50 = vsel %vm54_vm0, %v1507_v48, 0.0  ;;  %v1521_v52 = vld [vmem:[%s1920_s0 + $0xe0] sm:$0xff] }
  0x13   :  { %68 = vadd.xlane.f32.xlu0 %v67_v18  ;;  %v136_v47 = vsel %vm54_vm0, %v1498_v45, 0.0  ;;  %v94_v51 = vsel %vm54_vm0, %v1512_v49, 0.0  ;;  %v1526_v53 = vld [vmem:[%s1920_s0 + $0xe8] sm:$0xff]  ;;  %v139_v54 = vsel %vm54_vm0, %v1521_v52, 0.0  ;;  %v1535_v56 = vld [vmem:[%s1920_s0 + $0x70] sm:$0xff]  ;;  %v1540_v57 = vld [vmem:[%s1920_s0 + $0x78] sm:$0xff] }
  0x14   :  { %71 = vadd.xlane.f32.xlu1 %v70_v19  ;;  %v142_v55 = vsel %vm54_vm0, %v1526_v53, 0.0  ;;  %v97_v58 = vsel %vm54_vm0, %v1535_v56, 0.0  ;;  %v100_v59 = vsel %vm54_vm0, %v1540_v57, 0.0  ;;  %v1549_v60 = vld [vmem:[%s1920_s0 + $0xf0] sm:$0xff]  ;;  %v1554_v61 = vld [vmem:[%s1920_s0 + $0xf8] sm:$0xff] }
  0x15   :  { %v145_v62 = vsel %vm54_vm0, %v1549_v60, 0.0  ;;  %v148_v63 = vsel %vm54_vm0, %v1554_v61, 0.0 }
  0x17   :  { %116 = vadd.xlane.f32.xlu0 %v115_v22 }
  0x18   :  { %119 = vadd.xlane.f32.xlu1 %v118_v23 }
  0x1b   :  { %74 = vadd.xlane.f32.xlu0 %v73_v26 }
  0x1c   :  { %77 = vadd.xlane.f32.xlu1 %v76_v27 }
  0x1f   :  { %122 = vadd.xlane.f32.xlu0 %v121_v30 }
  0x20   :  { %125 = vadd.xlane.f32.xlu1 %v124_v31 }
  0x23   :  { %80 = vadd.xlane.f32.xlu0 %v79_v34 }
  0x24   :  { %83 = vadd.xlane.f32.xlu1 %v82_v35 }
  0x27   :  { %128 = vadd.xlane.f32.xlu0 %v127_v38 }
  0x28   :  { %131 = vadd.xlane.f32.xlu1 %v130_v39 }
  0x2b   :  { %86 = vadd.xlane.f32.xlu0 %v85_v42 }
  0x2c   :  { %89 = vadd.xlane.f32.xlu1 %v88_v43 }
  0x2f   :  { %134 = vadd.xlane.f32.xlu0 %v133_v46 }
  0x30   :  { %137 = vadd.xlane.f32.xlu1 %v136_v47 }
  0x33   :  { %92 = vadd.xlane.f32.xlu0 %v91_v50 }
  0x34   :  { %95 = vadd.xlane.f32.xlu1 %v94_v51 }
  0x37   :  { %140 = vadd.xlane.f32.xlu0 %v139_v54 }
  0x38   :  { %143 = vadd.xlane.f32.xlu1 %v142_v55 }
  0x3b   :  { %98 = vadd.xlane.f32.xlu0 %v97_v58 }
  0x3c   :  { %101 = vadd.xlane.f32.xlu1 %v100_v59 }
  0x3f   :  { %146 = vadd.xlane.f32.xlu0 %v145_v62 }
  0x40   :  { %149 = vadd.xlane.f32.xlu1 %v148_v63 }
  0x8c   :  { %v57_v3 = vpop.xlane.xlu0 %56 }
  0x8d   :  { %v105_v4 = vpop.xlane.xlu1 %104  ;;  %v152_v6 = vmul.f32 0.03125, %v57_v3 }
  0x8e   :  { %v168_v7 = vmul.f32 0.03125, %v105_v4 }
  0x8f   :  { %v1561_v10 = vsub.f32 %v1339_v0, %v152_v6 }
  0x90   :  { %v1564_v11 = vsub.f32 %v1344_v1, %v168_v7  ;;  %v60_v14 = vpop.xlane.xlu0 %59 }
  0x91   :  { %v108_v16 = vpop.xlane.xlu1 %107  ;;  %v153_v18 = vmul.f32 0.03125, %v60_v14  ;;  %v216_v22 = vmul.f32 %v1561_v10, %v1561_v10 }
  0x92   :  { %v169_v19 = vmul.f32 0.03125, %v108_v16  ;;  %v232_v23 = vmul.f32 %v1564_v11, %v1564_v11 }
  0x93   :  { %v1571_v26 = vsub.f32 %v1349_v2, %v153_v18  ;;  %v248_v0 = vsel %vm54_vm0, %v216_v22, 0.0 }
  0x94   :  { %v1574_v27 = vsub.f32 %v1358_v5, %v169_v19  ;;  %249 = vadd.xlane.f32.xlu0 %v248_v0  ;;  %v63_v1 = vpop.xlane.xlu0 %62  ;;  %v296_v31 = vsel %vm54_vm0, %v232_v23, 0.0 }
  0x95   :  { %v66_v30 = vpop.xlane.xlu1 %65  ;;  %v154_v34 = vmul.f32 0.03125, %v63_v1  ;;  %v217_v38 = vmul.f32 %v1571_v26, %v1571_v26 }
  0x96   :  { %v155_v35 = vmul.f32 0.03125, %v66_v30  ;;  %v233_v39 = vmul.f32 %v1574_v27, %v1574_v27 }
  0x97   :  { %v1583_v2 = vsub.f32 %v1367_v8, %v154_v34  ;;  %v251_v42 = vsel %vm54_vm0, %v217_v38, 0.0 }
  0x98   :  { %v1586_v5 = vsub.f32 %v1372_v9, %v155_v35  ;;  %297 = vadd.xlane.f32.xlu0 %v296_v31  ;;  %252 = vadd.xlane.f32.xlu1 %v251_v42  ;;  %v111_v43 = vpop.xlane.xlu0 %110  ;;  %v299_v47 = vsel %vm54_vm0, %v233_v39, 0.0 }
  0x99   :  { %v114_v46 = vpop.xlane.xlu1 %113  ;;  %v170_v50 = vmul.f32 0.03125, %v111_v43  ;;  %v218_v54 = vmul.f32 %v1583_v2, %v1583_v2 }
  0x9a   :  { %v171_v51 = vmul.f32 0.03125, %v114_v46  ;;  %v219_v8 = vmul.f32 %v1586_v5, %v1586_v5 }
  0x9b   :  { %v1595_v55 = vsub.f32 %v1381_v12, %v170_v50  ;;  %v254_v58 = vsel %vm54_vm0, %v218_v54, 0.0 }
  0x9c   :  { %v1598_v9 = vsub.f32 %v1386_v13, %v171_v51  ;;  %300 = vadd.xlane.f32.xlu1 %v299_v47  ;;  %255 = vadd.xlane.f32.xlu0 %v254_v58  ;;  %v69_v59 = vpop.xlane.xlu0 %68  ;;  %v257_v63 = vsel %vm54_vm0, %v219_v8, 0.0 }
  0x9d   :  { %v72_v62 = vpop.xlane.xlu1 %71  ;;  %v156_v3 = vmul.f32 0.03125, %v69_v59  ;;  %v234_v6 = vmul.f32 %v1595_v55, %v1595_v55 }
  0x9e   :  { %v157_v4 = vmul.f32 0.03125, %v72_v62  ;;  %v235_v12 = vmul.f32 %v1598_v9, %v1598_v9 }
  0x9f   :  { %v1607_v7 = vsub.f32 %v1393_v15, %v156_v3  ;;  %v302_v14 = vsel %vm54_vm0, %v234_v6, 0.0 }
  0xa0   :  { %v1610_v13 = vsub.f32 %v1400_v17, %v157_v4  ;;  %258 = vadd.xlane.f32.xlu1 %v257_v63  ;;  %303 = vadd.xlane.f32.xlu0 %v302_v14  ;;  %v117_v16 = vpop.xlane.xlu0 %116  ;;  %v305_v19 = vsel %vm54_vm0, %v235_v12, 0.0 }
  0xa1   :  { %v120_v18 = vpop.xlane.xlu1 %119  ;;  %v172_v22 = vmul.f32 0.03125, %v117_v16  ;;  %v220_v0 = vmul.f32 %v1607_v7, %v1607_v7 }
  0xa2   :  { %v173_v23 = vmul.f32 0.03125, %v120_v18  ;;  %v221_v15 = vmul.f32 %v1610_v13, %v1610_v13 }
  0xa3   :  { %v1619_v1 = vsub.f32 %v1409_v20, %v172_v22  ;;  %v260_v30 = vsel %vm54_vm0, %v220_v0, 0.0 }
  0xa4   :  { %v1622_v17 = vsub.f32 %v1414_v21, %v173_v23  ;;  %306 = vadd.xlane.f32.xlu1 %v305_v19  ;;  %261 = vadd.xlane.f32.xlu0 %v260_v30  ;;  %v75_v31 = vpop.xlane.xlu0 %74  ;;  %v263_v35 = vsel %vm54_vm0, %v221_v15, 0.0 }
  0xa5   :  { %v78_v34 = vpop.xlane.xlu1 %77  ;;  %v158_v38 = vmul.f32 0.03125, %v75_v31  ;;  %v236_v42 = vmul.f32 %v1619_v1, %v1619_v1 }
  0xa6   :  { %v159_v39 = vmul.f32 0.03125, %v78_v34  ;;  %v237_v20 = vmul.f32 %v1622_v17, %v1622_v17 }
  0xa7   :  { %v1631_v43 = vsub.f32 %v1423_v24, %v158_v38  ;;  %v308_v46 = vsel %vm54_vm0, %v236_v42, 0.0 }
  0xa8   :  { %v1634_v21 = vsub.f32 %v1428_v25, %v159_v39  ;;  %264 = vadd.xlane.f32.xlu1 %v263_v35  ;;  %309 = vadd.xlane.f32.xlu0 %v308_v46  ;;  %v123_v47 = vpop.xlane.xlu0 %122  ;;  %v311_v51 = vsel %vm54_vm0, %v237_v20, 0.0 }
  0xa9   :  { %v126_v50 = vpop.xlane.xlu1 %125  ;;  %v174_v54 = vmul.f32 0.03125, %v123_v47  ;;  %v222_v58 = vmul.f32 %v1631_v43, %v1631_v43 }
  0xaa   :  { %v175_v8 = vmul.f32 0.03125, %v126_v50  ;;  %v223_v24 = vmul.f32 %v1634_v21, %v1634_v21 }
  0xab   :  { %v1643_v59 = vsub.f32 %v1437_v28, %v174_v54  ;;  %v266_v62 = vsel %vm54_vm0, %v222_v58, 0.0 }
  0xac   :  { %v1646_v25 = vsub.f32 %v1442_v29, %v175_v8  ;;  %312 = vadd.xlane.f32.xlu1 %v311_v51  ;;  %267 = vadd.xlane.f32.xlu0 %v266_v62  ;;  %v81_v63 = vpop.xlane.xlu0 %80  ;;  %v269_v4 = vsel %vm54_vm0, %v223_v24, 0.0 }
  0xad   :  { %v84_v3 = vpop.xlane.xlu1 %83  ;;  %v160_v6 = vmul.f32 0.03125, %v81_v63  ;;  %v238_v14 = vmul.f32 %v1643_v59, %v1643_v59 }
  0xae   :  { %v161_v12 = vmul.f32 0.03125, %v84_v3  ;;  %v239_v28 = vmul.f32 %v1646_v25, %v1646_v25 }
  0xaf   :  { %v1655_v16 = vsub.f32 %v1451_v32, %v160_v6  ;;  %v314_v18 = vsel %vm54_vm0, %v238_v14, 0.0 }
  0xb0   :  { %v1658_v29 = vsub.f32 %v1456_v33, %v161_v12  ;;  %270 = vadd.xlane.f32.xlu1 %v269_v4  ;;  %315 = vadd.xlane.f32.xlu0 %v314_v18  ;;  %v129_v19 = vpop.xlane.xlu0 %128  ;;  %v317_v23 = vsel %vm54_vm0, %v239_v28, 0.0  ;;  %v1215_v4 = vld [vmem:[%s1923_s3 + $0x8] sm:$0xff]  }
  0xb1   :  { %v132_v22 = vpop.xlane.xlu1 %131  ;;  %v176_v0 = vmul.f32 0.03125, %v129_v19  ;;  %v224_v30 = vmul.f32 %v1655_v16, %v1655_v16  ;;  %1172 = vmatprep.subr.bf16.mxu0 %v1215_v4  ;;  %1208 = vmatprep.subr.bf16.mxu1 %v1215_v4 }
  0xb2   :  { %v177_v15 = vmul.f32 0.03125, %v132_v22  ;;  %v225_v32 = vmul.f32 %v1658_v29, %v1658_v29  ;;  %1173 = vmatpush3.bf16.msra.mxu0 %v1215_v4  ;;  %1210 = vmatpush3.bf16.msra.mxu1 %v1215_v4 }
  0xb3   :  { %v1667_v31 = vsub.f32 %v1465_v36, %v176_v0  ;;  %v272_v34 = vsel %vm54_vm0, %v224_v30, 0.0  ;;  %v1216_v0 = vld [vmem:[%s1923_s3] sm:$0xff]  }
  0xb4   :  { %v1670_v33 = vsub.f32 %v1470_v37, %v177_v15  ;;  %318 = vadd.xlane.f32.xlu1 %v317_v23  ;;  %273 = vadd.xlane.f32.xlu0 %v272_v34  ;;  %v87_v35 = vpop.xlane.xlu0 %86  ;;  %v275_v39 = vsel %vm54_vm0, %v225_v32, 0.0 }
  0xb5   :  { %v90_v38 = vpop.xlane.xlu1 %89  ;;  %v162_v42 = vmul.f32 0.03125, %v87_v35  ;;  %v240_v46 = vmul.f32 %v1667_v31, %v1667_v31  ;;  %1174 = vmatprep.subr.bf16.mxu0 %v1216_v0  ;;  %1209 = vmatprep.subr.bf16.mxu1 %v1216_v0 }
  0xb6   :  { %v163_v20 = vmul.f32 0.03125, %v90_v38  ;;  %v241_v36 = vmul.f32 %v1670_v33, %v1670_v33  ;;  %1175 = vmatpush3.bf16.msra.mxu0 %v1216_v0  ;;  %1211 = vmatpush3.bf16.msra.mxu1 %v1216_v0 }
  0xb7   :  { %v1679_v47 = vsub.f32 %v1479_v40, %v162_v42  ;;  %v320_v50 = vsel %vm54_vm0, %v240_v46, 0.0 }
  0xb8   :  { %v1682_v37 = vsub.f32 %v1484_v41, %v163_v20  ;;  %276 = vadd.xlane.f32.xlu1 %v275_v39  ;;  %321 = vadd.xlane.f32.xlu0 %v320_v50  ;;  %v135_v51 = vpop.xlane.xlu0 %134  ;;  %v323_v8 = vsel %vm54_vm0, %v241_v36, 0.0 }
  0xb9   :  { %v138_v54 = vpop.xlane.xlu1 %137  ;;  %v178_v58 = vmul.f32 0.03125, %v135_v51  ;;  %v226_v62 = vmul.f32 %v1679_v47, %v1679_v47 }
  0xba   :  { %v179_v24 = vmul.f32 0.03125, %v138_v54  ;;  %v227_v40 = vmul.f32 %v1682_v37, %v1682_v37 }
  0xbb   :  { %v1691_v63 = vsub.f32 %v1493_v44, %v178_v58  ;;  %v278_v3 = vsel %vm54_vm0, %v226_v62, 0.0 }
  0xbc   :  { %v1694_v41 = vsub.f32 %v1498_v45, %v179_v24  ;;  %324 = vadd.xlane.f32.xlu1 %v323_v8  ;;  %279 = vadd.xlane.f32.xlu0 %v278_v3  ;;  %v93_v6 = vpop.xlane.xlu0 %92  ;;  %v281_v14 = vsel %vm54_vm0, %v227_v40, 0.0 }
  0xbd   :  { %v96_v12 = vpop.xlane.xlu1 %95  ;;  %v164_v28 = vmul.f32 0.03125, %v93_v6  ;;  %v242_v44 = vmul.f32 %v1691_v63, %v1691_v63 }
  0xbe   :  { %v165_v18 = vmul.f32 0.03125, %v96_v12  ;;  %v243_v45 = vmul.f32 %v1694_v41, %v1694_v41 }
  0xbf   :  { %v1706_v19 = vsub.f32 %v1507_v48, %v164_v28  ;;  %v326_v23 = vsel %vm54_vm0, %v242_v44, 0.0 }
  0xc0   :  { %v1709_v22 = vsub.f32 %v1512_v49, %v165_v18  ;;  %282 = vadd.xlane.f32.xlu1 %v281_v14  ;;  %327 = vadd.xlane.f32.xlu0 %v326_v23  ;;  %v141_v15 = vpop.xlane.xlu0 %140  ;;  %v329_v32 = vsel %vm54_vm0, %v243_v45, 0.0 }
  0xc1   :  { %v144_v30 = vpop.xlane.xlu1 %143  ;;  %v180_v34 = vmul.f32 0.03125, %v141_v15  ;;  %v228_v48 = vmul.f32 %v1706_v19, %v1706_v19 }
  0xc2   :  { %v181_v35 = vmul.f32 0.03125, %v144_v30  ;;  %v229_v49 = vmul.f32 %v1709_v22, %v1709_v22 }
  0xc3   :  { %v1721_v38 = vsub.f32 %v1521_v52, %v180_v34  ;;  %v284_v42 = vsel %vm54_vm0, %v228_v48, 0.0 }
  0xc4   :  { %v1724_v39 = vsub.f32 %v1526_v53, %v181_v35  ;;  %330 = vadd.xlane.f32.xlu1 %v329_v32  ;;  %285 = vadd.xlane.f32.xlu0 %v284_v42  ;;  %v99_v20 = vpop.xlane.xlu0 %98  ;;  %v287_v36 = vsel %vm54_vm0, %v229_v49, 0.0 }
  0xc5   :  { %v102_v46 = vpop.xlane.xlu1 %101  ;;  %v166_v50 = vmul.f32 0.03125, %v99_v20  ;;  %v244_v54 = vmul.f32 %v1721_v38, %v1721_v38 }
  0xc6   :  { %v167_v51 = vmul.f32 0.03125, %v102_v46  ;;  %v245_v52 = vmul.f32 %v1724_v39, %v1724_v39 }
  0xc7   :  { %v1733_v8 = vsub.f32 %v1535_v56, %v166_v50  ;;  %v332_v58 = vsel %vm54_vm0, %v244_v54, 0.0 }
  0xc8   :  { %v1736_v53 = vsub.f32 %v1540_v57, %v167_v51  ;;  %288 = vadd.xlane.f32.xlu1 %v287_v36  ;;  %333 = vadd.xlane.f32.xlu0 %v332_v58  ;;  %v147_v24 = vpop.xlane.xlu0 %146  ;;  %v335_v40 = vsel %vm54_vm0, %v245_v52, 0.0 }
  0xc9   :  { %v150_v62 = vpop.xlane.xlu1 %149  ;;  %v182_v3 = vmul.f32 0.03125, %v147_v24  ;;  %v230_v6 = vmul.f32 %v1733_v8, %v1733_v8 }
  0xca   :  { %v183_v4 = vmul.f32 0.03125, %v150_v62  ;;  %v231_v56 = vmul.f32 %v1736_v53, %v1736_v53 }
  0xcb   :  { %v1745_v12 = vsub.f32 %v1549_v60, %v182_v3  ;;  %v290_v14 = vsel %vm54_vm0, %v230_v6, 0.0 }
  0xcc   :  { %v1748_v57 = vsub.f32 %v1554_v61, %v183_v4  ;;  %336 = vadd.xlane.f32.xlu1 %v335_v40  ;;  %291 = vadd.xlane.f32.xlu0 %v290_v14  ;;  %v293_v28 = vsel %vm54_vm0, %v231_v56, 0.0 }
  0xcd   :  { %v246_v18 = vmul.f32 %v1745_v12, %v1745_v12 }
  0xce   :  { %v247_v44 = vmul.f32 %v1748_v57, %v1748_v57 }
  0xcf   :  { %v338_v45 = vsel %vm54_vm0, %v246_v18, 0.0 }
  0xd0   :  { %294 = vadd.xlane.f32.xlu1 %v293_v28  ;;  %339 = vadd.xlane.f32.xlu0 %v338_v45  ;;  %v341_v60 = vsel %vm54_vm0, %v247_v44, 0.0  ;;  %v1762_v44 = vld [vmem:[%s1921_s1] ss:$0 sm:$0xff] }
  0xd4   :  { %342 = vadd.xlane.f32.xlu1 %v341_v60 }
 0x11d   :  { %v250_v61 = vpop.xlane.xlu0 %249 }
 0x11e   :  { %v344_v23 = vmul.f32 0.03125, %v250_v61 }
 0x120   :  { %v376_v0 = vadd.f32 1e-05, %v344_v23 }
 0x121   :  { %v253_v15 = vpop.xlane.xlu1 %252  ;;  %v298_v30 = vpop.xlane.xlu0 %297 }
 0x122   :  { %1217 = vrsqrt.f32 %v376_v0  ;;  %v345_v32 = vmul.f32 0.03125, %v253_v15  ;;  %v360_v34 = vmul.f32 0.03125, %v298_v30 }
 0x124   :  { %v377_v35 = vadd.f32 1e-05, %v345_v32  ;;  %v392_v48 = vadd.f32 1e-05, %v360_v34 }
 0x125   :  { %v301_v49 = vpop.xlane.xlu1 %300  ;;  %v256_v42 = vpop.xlane.xlu0 %255 }
 0x126   :  { %1219 = vrsqrt.f32 %v377_v35  ;;  %v361_v20 = vmul.f32 0.03125, %v301_v49  ;;  %v346_v46 = vmul.f32 0.03125, %v256_v42 }
 0x127   :  { %1221 = vrsqrt.f32 %v392_v48 }
 0x128   :  { %v393_v36 = vadd.f32 1e-05, %v361_v20  ;;  %v378_v50 = vadd.f32 1e-05, %v346_v46 }
 0x129   :  { %v259_v51 = vpop.xlane.xlu1 %258  ;;  %v304_v54 = vpop.xlane.xlu0 %303 }
 0x12a   :  { %1223 = vrsqrt.f32 %v393_v36  ;;  %v347_v52 = vmul.f32 0.03125, %v259_v51  ;;  %v362_v58 = vmul.f32 0.03125, %v304_v54 }
 0x12b   :  { %1225 = vrsqrt.f32 %v378_v50 }
 0x12c   :  { %v379_v24 = vadd.f32 1e-05, %v347_v52  ;;  %v394_v62 = vadd.f32 1e-05, %v362_v58 }
 0x12d   :  { %v307_v40 = vpop.xlane.xlu1 %306  ;;  %v262_v3 = vpop.xlane.xlu0 %261 }
 0x12e   :  { %1227 = vrsqrt.f32 %v379_v24  ;;  %v363_v4 = vmul.f32 0.03125, %v307_v40  ;;  %v348_v6 = vmul.f32 0.03125, %v262_v3 }
 0x12f   :  { %v1218_v56 = vpop.eup %1217  ;;  %1229 = vrsqrt.f32 %v394_v62 }
 0x130   :  { %v395_v14 = vadd.f32 1e-05, %v363_v4  ;;  %v380_v28 = vadd.f32 1e-05, %v348_v6  ;;  %v440_v18 = vmul.f32 %v1218_v56, %v1561_v10  ;;  %v1769_v10 = vld [vmem:[%s1922_s2] ss:$0 sm:$0xff] }
 0x131   :  { %v265_v45 = vpop.xlane.xlu1 %264  ;;  %v310_v60 = vpop.xlane.xlu0 %309 }
 0x132   :  { %1231 = vrsqrt.f32 %v395_v14  ;;  %v349_v61 = vmul.f32 0.03125, %v265_v45  ;;  %v364_v23 = vmul.f32 0.03125, %v310_v60  ;;  %v479_v15 = vmul.f32 %v1762_v44, %v440_v18 }
 0x133   :  { %v1220_v0 = vpop.eup %1219  ;;  %1233 = vrsqrt.f32 %v380_v28 }
 0x134   :  { %v1222_v30 = vpop.eup %1221  ;;  %v381_v32 = vadd.f32 1e-05, %v349_v61  ;;  %v396_v34 = vadd.f32 1e-05, %v364_v23  ;;  %v441_v35 = vmul.f32 %v1220_v0, %v1571_v26  ;;  %v518_v51 = vadd.f32 %v1769_v10, %v479_v15 }
 0x135   :  { %v313_v48 = vpop.xlane.xlu1 %312  ;;  %v268_v49 = vpop.xlane.xlu0 %267  ;;  %v456_v42 = vmul.f32 %v1222_v30, %v1564_v11 }
 0x136   :  { %1235 = vrsqrt.f32 %v381_v32  ;;  %v365_v20 = vmul.f32 0.03125, %v313_v48  ;;  %v350_v46 = vmul.f32 0.03125, %v268_v49  ;;  %v480_v36 = vmul.f32 %v1762_v44, %v441_v35 }
 0x137   :  { %v1224_v50 = vpop.eup %1223  ;;  %1237 = vrsqrt.f32 %v396_v34  ;;  %v495_v11 = vmul.f32 %v1762_v44, %v456_v42 }
 0x138   :  { %v1226_v54 = vpop.eup %1225  ;;  %v397_v26 = vadd.f32 1e-05, %v365_v20  ;;  %v382_v52 = vadd.f32 1e-05, %v350_v46  ;;  %v519_v58 = vadd.f32 %v1769_v10, %v480_v36  ;;  %v457_v24 = vmul.f32 %v1224_v50, %v1574_v27 }
 0x139   :  { %v271_v62 = vpop.xlane.xlu1 %270  ;;  %v316_v40 = vpop.xlane.xlu0 %315  ;;  %v442_v3 = vmul.f32 %v1226_v54, %v1583_v2  ;;  %v534_v2 = vadd.f32 %v1769_v10, %v495_v11 }
 0x13a   :  { %1239 = vrsqrt.f32 %v397_v26  ;;  %v351_v4 = vmul.f32 0.03125, %v271_v62  ;;  %v366_v6 = vmul.f32 0.03125, %v316_v40  ;;  %v550_v56 = vpack.c.bf16 %v519_v58, %v518_v51 }
 0x13b   :  { %v1228_v14 = vpop.eup %1227  ;;  %1241 = vrsqrt.f32 %v382_v52  ;;  %v496_v28 = vmul.f32 %v1762_v44, %v457_v24  ;;  %v481_v18 = vmul.f32 %v1762_v44, %v442_v3 }
 0x13c   :  { %v1230_v45 = vpop.eup %1229  ;;  %v383_v60 = vadd.f32 1e-05, %v351_v4  ;;  %v398_v61 = vadd.f32 1e-05, %v366_v6  ;;  %1176 = vmatprep.mubr.msk.bf16.mxu0 %vm54_vm0, %v550_v56  ;;  %v443_v27 = vmul.f32 %v1228_v14, %v1586_v5 }
 0x13d   :  { %v319_v23 = vpop.xlane.xlu1 %318  ;;  %v274_v0 = vpop.xlane.xlu0 %273  ;;  %v535_v15 = vadd.f32 %v1769_v10, %v496_v28  ;;  %v458_v30 = vmul.f32 %v1230_v45, %v1595_v55  ;;  %v520_v42 = vadd.f32 %v1769_v10, %v481_v18 }
 0x13e   :  { %1243 = vrsqrt.f32 %v383_v60  ;;  %v367_v32 = vmul.f32 0.03125, %v319_v23  ;;  %v352_v34 = vmul.f32 0.03125, %v274_v0  ;;  %v482_v35 = vmul.f32 %v1762_v44, %v443_v27 }
 0x13f   :  { %v1232_v48 = vpop.eup %1231  ;;  %1245 = vrsqrt.f32 %v398_v61  ;;  %v558_v49 = vpack.c.bf16 %v535_v15, %v534_v2  ;;  %v497_v54 = vmul.f32 %v1762_v44, %v458_v30 }
 0x140   :  { %v1234_v20 = vpop.eup %1233  ;;  %v399_v5 = vadd.f32 1e-05, %v367_v32  ;;  %v384_v46 = vadd.f32 1e-05, %v352_v34  ;;  %v521_v36 = vadd.f32 %v1769_v10, %v482_v35  ;;  %v459_v50 = vmul.f32 %v1232_v48, %v1598_v9 }
 0x141   :  { %1192 = vmatprep.mubr.msk.bf16.mxu1 %vm54_vm0, %v558_v49  ;;  %v277_v55 = vpop.xlane.xlu1 %276  ;;  %v322_v51 = vpop.xlane.xlu0 %321  ;;  %v444_v26 = vmul.f32 %v1234_v20, %v1607_v7  ;;  %v536_v7 = vadd.f32 %v1769_v10, %v497_v54 }
 0x142   :  { %1247 = vrsqrt.f32 %v399_v5  ;;  %v353_v52 = vmul.f32 0.03125, %v277_v55  ;;  %v368_v58 = vmul.f32 0.03125, %v322_v51  ;;  %v551_v24 = vpack.c.bf16 %v521_v36, %v520_v42 }
 0x143   :  { %v1236_v62 = vpop.eup %1235  ;;  %1249 = vrsqrt.f32 %v384_v46  ;;  %v498_v40 = vmul.f32 %v1762_v44, %v459_v50  ;;  %v483_v11 = vmul.f32 %v1762_v44, %v444_v26 }
 0x144   :  { %v1238_v3 = vpop.eup %1237  ;;  %v385_v9 = vadd.f32 1e-05, %v353_v52  ;;  %v400_v4 = vadd.f32 1e-05, %v368_v58  ;;  %1177 = vmatmul.mubr.msk.bf16.vlgmr.msra.gmra.mxu0 %vm54_vm0, %v551_v24  ;;  %v445_v6 = vmul.f32 %v1236_v62, %v1610_v13 }
 0x145   :  { %v325_v56 = vpop.xlane.xlu1 %324  ;;  %v280_v14 = vpop.xlane.xlu0 %279  ;;  %v537_v28 = vadd.f32 %v1769_v10, %v498_v40  ;;  %v460_v18 = vmul.f32 %v1238_v3, %v1619_v1  ;;  %v522_v0 = vadd.f32 %v1769_v10, %v483_v11 }
 0x146   :  { %1251 = vrsqrt.f32 %v385_v9  ;;  %v369_v45 = vmul.f32 0.03125, %v325_v56  ;;  %v354_v60 = vmul.f32 0.03125, %v280_v14  ;;  %v484_v61 = vmul.f32 %v1762_v44, %v445_v6 }
 0x147   :  { %v1240_v27 = vpop.eup %1239  ;;  %1253 = vrsqrt.f32 %v400_v4  ;;  %v559_v23 = vpack.c.bf16 %v537_v28, %v536_v7  ;;  %v499_v35 = vmul.f32 %v1762_v44, %v460_v18 }
 0x148   :  { %v1242_v2 = vpop.eup %1241  ;;  %v401_v13 = vadd.f32 1e-05, %v369_v45  ;;  %v386_v15 = vadd.f32 1e-05, %v354_v60  ;;  %v523_v30 = vadd.f32 %v1769_v10, %v484_v61  ;;  %v461_v32 = vmul.f32 %v1240_v27, %v1622_v17 }
 0x149   :  { %1193 = vmatmul.mubr.msk.bf16.vlgmr.msra.gmra.mxu1 %vm54_vm0, %v559_v23  ;;  %v283_v1 = vpop.xlane.xlu1 %282  ;;  %v328_v34 = vpop.xlane.xlu0 %327  ;;  %v446_v48 = vmul.f32 %v1242_v2, %v1631_v43  ;;  %v538_v43 = vadd.f32 %v1769_v10, %v499_v35 }
 0x14a   :  { %1255 = vrsqrt.f32 %v401_v13  ;;  %v355_v49 = vmul.f32 0.03125, %v283_v1  ;;  %v370_v42 = vmul.f32 0.03125, %v328_v34  ;;  %v552_v20 = vpack.c.bf16 %v523_v30, %v522_v0 }
 0x14b   :  { %v1244_v5 = vpop.eup %1243  ;;  %1257 = vrsqrt.f32 %v386_v15  ;;  %v500_v46 = vmul.f32 %v1762_v44, %v461_v32  ;;  %v485_v36 = vmul.f32 %v1762_v44, %v446_v48 }
 0x14c   :  { %v1246_v50 = vpop.eup %1245  ;;  %v387_v17 = vadd.f32 1e-05, %v355_v49  ;;  %v402_v55 = vadd.f32 1e-05, %v370_v42  ;;  %1180 = vmatprep.mubr.msk.bf16.mxu0 %vm54_vm0, %v552_v20  ;;  %v447_v51 = vmul.f32 %v1244_v5, %v1634_v21 }
 0x14d   :  { %v331_v54 = vpop.xlane.xlu1 %330  ;;  %v286_v26 = vpop.xlane.xlu0 %285  ;;  %v539_v52 = vadd.f32 %v1769_v10, %v500_v46  ;;  %v462_v58 = vmul.f32 %v1246_v50, %v1643_v59  ;;  %v524_v9 = vadd.f32 %v1769_v10, %v485_v36 }
 0x14e   :  { %1259 = vrsqrt.f32 %v387_v17  ;;  %v371_v24 = vmul.f32 0.03125, %v331_v54  ;;  %v356_v62 = vmul.f32 0.03125, %v286_v26  ;;  %v486_v40 = vmul.f32 %v1762_v44, %v447_v51 }
 0x14f   :  { %v1248_v11 = vpop.eup %1247  ;;  %1261 = vrsqrt.f32 %v402_v55  ;;  %v560_v3 = vpack.c.bf16 %v539_v52, %v538_v43  ;;  %v501_v28 = vmul.f32 %v1762_v44, %v462_v58 }
 0x150   :  { %v1250_v4 = vpop.eup %1249  ;;  %v403_v21 = vadd.f32 1e-05, %v371_v24  ;;  %v388_v6 = vadd.f32 1e-05, %v356_v62  ;;  %v525_v56 = vadd.f32 %v1769_v10, %v486_v40  ;;  %v463_v14 = vmul.f32 %v1248_v11, %v1646_v25 }
 0x151   :  { %1196 = vmatprep.mubr.msk.bf16.mxu1 %vm54_vm0, %v560_v3  ;;  %v289_v59 = vpop.xlane.xlu1 %288  ;;  %v334_v7 = vpop.xlane.xlu0 %333  ;;  %v448_v18 = vmul.f32 %v1250_v4, %v1655_v16  ;;  %v540_v16 = vadd.f32 %v1769_v10, %v501_v28 }
 0x152   :  { %1263 = vrsqrt.f32 %v403_v21  ;;  %v357_v45 = vmul.f32 0.03125, %v289_v59  ;;  %v372_v60 = vmul.f32 0.03125, %v334_v7  ;;  %v553_v61 = vpack.c.bf16 %v525_v56, %v524_v9 }
 0x153   :  { %v1252_v27 = vpop.eup %1251  ;;  %1265 = vrsqrt.f32 %v388_v6  ;;  %v502_v23 = vmul.f32 %v1762_v44, %v463_v14  ;;  %v487_v0 = vmul.f32 %v1762_v44, %v448_v18 }
 0x154   :  { %v1254_v2 = vpop.eup %1253  ;;  %v389_v25 = vadd.f32 1e-05, %v357_v45  ;;  %v404_v13 = vadd.f32 1e-05, %v372_v60  ;;  %1181 = vmatmul.mubr.msk.bf16.gmra.mxu0 %vm54_vm0, %v553_v61  ;;  %v449_v15 = vmul.f32 %v1252_v27, %v1658_v29 }
 0x155   :  { %v337_v30 = vpop.xlane.xlu1 %336  ;;  %v292_v32 = vpop.xlane.xlu0 %291  ;;  %v541_v1 = vadd.f32 %v1769_v10, %v502_v23  ;;  %v464_v34 = vmul.f32 %v1254_v2, %v1667_v31  ;;  %v526_v5 = vadd.f32 %v1769_v10, %v487_v0 }
 0x156   :  { %1267 = vrsqrt.f32 %v389_v25  ;;  %v373_v35 = vmul.f32 0.03125, %v337_v30  ;;  %v358_v48 = vmul.f32 0.03125, %v292_v32  ;;  %v488_v49 = vmul.f32 %v1762_v44, %v449_v15 }
 0x157   :  { %v1256_v42 = vpop.eup %1255  ;;  %1269 = vrsqrt.f32 %v404_v13  ;;  %v561_v20 = vpack.c.bf16 %v541_v1, %v540_v16  ;;  %v503_v51 = vmul.f32 %v1762_v44, %v464_v34 }
 0x158   :  { %v1258_v46 = vpop.eup %1257  ;;  %v405_v29 = vadd.f32 1e-05, %v373_v35  ;;  %v390_v36 = vadd.f32 1e-05, %v358_v48  ;;  %v527_v50 = vadd.f32 %v1769_v10, %v488_v49  ;;  %v465_v17 = vmul.f32 %v1256_v42, %v1670_v33 }
 0x159   :  { %1197 = vmatmul.mubr.msk.bf16.gmra.mxu1 %vm54_vm0, %v561_v20  ;;  %v295_v31 = vpop.xlane.xlu1 %294  ;;  %v340_v55 = vpop.xlane.xlu0 %339  ;;  %v450_v54 = vmul.f32 %v1258_v46, %v1679_v47  ;;  %v542_v47 = vadd.f32 %v1769_v10, %v503_v51 }
 0x15a   :  { %1271 = vrsqrt.f32 %v405_v29  ;;  %v359_v26 = vmul.f32 0.03125, %v295_v31  ;;  %v374_v43 = vmul.f32 0.03125, %v340_v55  ;;  %v554_v52 = vpack.c.bf16 %v527_v50, %v526_v5 }
 0x15b   :  { %v1260_v58 = vpop.eup %1259  ;;  %1273 = vrsqrt.f32 %v390_v36  ;;  %v504_v24 = vmul.f32 %v1762_v44, %v465_v17  ;;  %v489_v62 = vmul.f32 %v1762_v44, %v450_v54 }
 0x15c   :  { %v1262_v40 = vpop.eup %1261  ;;  %v391_v33 = vadd.f32 1e-05, %v359_v26  ;;  %v406_v11 = vadd.f32 1e-05, %v374_v43  ;;  %1184 = vmatprep.mubr.msk.bf16.mxu0 %vm54_vm0, %v554_v52  ;;  %v451_v3 = vmul.f32 %v1260_v58, %v1682_v37 }
 0x15d   :  { %v343_v9 = vpop.xlane.xlu1 %342  ;;  %v543_v4 = vadd.f32 %v1769_v10, %v504_v24  ;;  %v466_v21 = vmul.f32 %v1262_v40, %v1691_v63  ;;  %v528_v7 = vadd.f32 %v1769_v10, %v489_v62  ;;  %v1883_v24 = vld [vmem:[%s1924_s4] ss:$0 sm:$0xff]  ;;  %s1303_s4 = smov [#allocation2]  }
 0x15e   :  { %1275 = vrsqrt.f32 %v391_v33  ;;  %v375_v6 = vmul.f32 0.03125, %v343_v9  ;;  %v490_v56 = vmul.f32 %v1762_v44, %v451_v3  ;;  %s963_s13 = sshll.u32 %s1303_s4, 4  ;;  %s964_s13 = int_to_ptr.vmem [resolvable:$true] %s963_s13 }
 0x15f   :  { %v1264_v14 = vpop.eup %1263  ;;  %1277 = vrsqrt.f32 %v406_v11  ;;  %v562_v59 = vpack.c.bf16 %v543_v4, %v542_v47  ;;  %v505_v60 = vmul.f32 %v1762_v44, %v466_v21  ;;  %s1281_s14 = scalar_lea.vmem %s964_s13, 2048  ;;  %p1286_p1 = scmp.lt.s32.totalorder %s964_s13, %s964_s13 }
 0x160   :  { %v1266_v28 = vpop.eup %1265  ;;  %v407_v18 = vadd.f32 1e-05, %v375_v6  ;;  %v529_v37 = vadd.f32 %v1769_v10, %v490_v56  ;;  %v467_v45 = vmul.f32 %v1264_v14, %v1694_v41  ;;  %p1282_p0 = scmp.ne.s32.totalorder %s964_s13, %s1281_s14  ;;  %p1287_p2 = scmp.lt.s32.totalorder %s1281_s14, %s1281_s14 }
 0x161   :  { %1200 = vmatprep.mubr.msk.bf16.mxu1 %vm54_vm0, %v562_v59  ;;  %v452_v63 = vmul.f32 %v1266_v28, %v1706_v19  ;;  %v544_v2 = vadd.f32 %v1769_v10, %v505_v60 }
 0x162   :  { %1279 = vrsqrt.f32 %v407_v18  ;;  %v555_v61 = vpack.c.bf16 %v529_v37, %v528_v7  ;;  %v506_v27 = vmul.f32 %v1762_v44, %v467_v45  ;;  %p1288_p3 = por %p1287_p2, %p1286_p1 }
 0x163   :  { %v1268_v23 = vpop.eup %1267  ;;  %v491_v13 = vmul.f32 %v1762_v44, %v452_v63 }
 0x164   :  { %v1270_v0 = vpop.eup %1269  ;;  %1185 = vmatmul.mubr.msk.bf16.gmra.mxu0 %vm54_vm0, %v555_v61  ;;  %v545_v25 = vadd.f32 %v1769_v10, %v506_v27  ;;  %v453_v41 = vmul.f32 %v1268_v23, %v1709_v22  ;;  %p1289_p4 = pnand %p1288_p3, %p1282_p0 }
 0x165   :  { %v468_v15 = vmul.f32 %v1270_v0, %v1721_v38  ;;  %v530_v1 = vadd.f32 %v1769_v10, %v491_v13 }
 0x166   :  { %v563_v30 = vpack.c.bf16 %v545_v25, %v544_v2  ;;  %v492_v19 = vmul.f32 %v1762_v44, %v453_v41 }
 0x167   :  { %v1272_v32 = vpop.eup %1271  ;;  %v507_v48 = vmul.f32 %v1762_v44, %v468_v15 }
 0x168   :  { %v1274_v16 = vpop.eup %1273  ;;  %1201 = vmatmul.mubr.msk.bf16.gmra.mxu1 %vm54_vm0, %v563_v30  ;;  %v531_v34 = vadd.f32 %v1769_v10, %v492_v19  ;;  %v469_v35 = vmul.f32 %v1272_v32, %v1724_v39 }
 0x169   :  { %v454_v22 = vmul.f32 %v1274_v16, %v1733_v8  ;;  %v546_v5 = vadd.f32 %v1769_v10, %v507_v48 }
 0x16a   :  { %v556_v49 = vpack.c.bf16 %v531_v34, %v530_v1  ;;  %v508_v38 = vmul.f32 %v1762_v44, %v469_v35 }
 0x16b   :  { %v1276_v42 = vpop.eup %1275  ;;  %v493_v36 = vmul.f32 %v1762_v44, %v454_v22 }
 0x16c   :  { %v1278_v20 = vpop.eup %1277  ;;  %1188 = vmatprep.mubr.msk.bf16.mxu0 %vm54_vm0, %v556_v49  ;;  %v547_v46 = vadd.f32 %v1769_v10, %v508_v38  ;;  %v455_v29 = vmul.f32 %v1276_v42, %v1736_v53 }
 0x16d   :  { %v470_v39 = vmul.f32 %v1278_v20, %v1745_v12  ;;  %v532_v31 = vadd.f32 %v1769_v10, %v493_v36 }
 0x16e   :  { %v564_v50 = vpack.c.bf16 %v547_v46, %v546_v5  ;;  %v494_v8 = vmul.f32 %v1762_v44, %v455_v29 }
 0x16f   :  { %v1280_v17 = vpop.eup %1279  ;;  %v509_v54 = vmul.f32 %v1762_v44, %v470_v39 }
 0x170   :  { %1204 = vmatprep.mubr.msk.bf16.mxu1 %vm54_vm0, %v564_v50  ;;  %v533_v55 = vadd.f32 %v1769_v10, %v494_v8  ;;  %v471_v51 = vmul.f32 %v1280_v17, %v1748_v57 }
 0x171   :  { %v548_v12 = vadd.f32 %v1769_v10, %v509_v54 }
 0x172   :  { %v557_v26 = vpack.c.bf16 %v533_v55, %v532_v31  ;;  %v510_v53 = vmul.f32 %v1762_v44, %v471_v51 }
 0x174   :  { %1189 = vmatmul.mubr.msk.bf16.gmra.mxu0 %vm54_vm0, %v557_v26  ;;  %v549_v43 = vadd.f32 %v1769_v10, %v510_v53 }
 0x176   :  { %v565_v52 = vpack.c.bf16 %v549_v43, %v548_v12 }
 0x178   :  { %1205 = vmatmul.mubr.msk.bf16.gmra.mxu1 %vm54_vm0, %v565_v52 }
 0x204   :  { %v1178_v58 = vpop.f32.mrf.mxu0 }
 0x205   :  { %v680_v40 = vadd.f32 %v1178_v58, %v1883_v24 }
 0x206   :  { %v671_v57 = vpop.f32.mrf.mxu0 }
 0x207   :  { %v672_v3 = vadd.f32 %v1883_v24, %v671_v57 }
 0x208   :  { %v1179_v62 = vpop.f32.mrf.mxu0 }
 0x209   :  { %v683_v44 = vadd.f32 %v1179_v62, %v1883_v24  ;;  %v1194_v33 = vpop.f32.mrf.mxu1 }
 0x20a   :  { %v674_v11 = vpop.f32.mrf.mxu0  ;;  %v744_v6 = vadd.f32 %v1194_v33, %v1883_v24 }
 0x20b   :  { %v1067_v10 = vpack.c.bf16 %v683_v44, %v680_v40  ;;  %v675_v9 = vadd.f32 %v1883_v24, %v674_v11  ;;  %v735_v47 = vpop.f32.mrf.mxu1 }
 0x20c   :  { %v736_v59 = vadd.f32 %v1883_v24, %v735_v47 }
 0x20d   :  { %1139 = vst [vmem:[#allocation2 + $0x8] sm:$0xff] %v1067_v10   ;;  %v1062_v4 = vpack.c.bf16 %v675_v9, %v672_v3  ;;  %v1195_v21 = vpop.f32.mrf.mxu1 }
 0x20e   :  { %v747_v56 = vadd.f32 %v1195_v21, %v1883_v24 }
 0x20f   :  { %1063 = vst [vmem:[#allocation2] sm:$0xff] %v1062_v4   ;;  %v738_v14 = vpop.f32.mrf.mxu1 }
 0x210   :  { %v1107_v7 = vpack.c.bf16 %v747_v56, %v744_v6  ;;  %v739_v28 = vadd.f32 %v1883_v24, %v738_v14 }
 0x212   :  { %1147 = vst [vmem:[#allocation2 + $0x48] sm:$0xff] %v1107_v7   ;;  %v1102_v18 = vpack.c.bf16 %v739_v28, %v736_v59 }
 0x214   :  { %1146 = vst [vmem:[#allocation2 + $0x40] sm:$0xff] %v1102_v18   ;;  %v1182_v37 = vpop.f32.mrf.mxu0 }
 0x215   :  { %v696_v63 = vadd.f32 %v1182_v37, %v1883_v24 }
 0x216   :  { %v687_v45 = vpop.f32.mrf.mxu0 }
 0x217   :  { %v688_v0 = vadd.f32 %v1883_v24, %v687_v45 }
 0x218   :  { %v1183_v60 = vpop.f32.mrf.mxu0 }
 0x219   :  { %v699_v61 = vadd.f32 %v1183_v60, %v1883_v24  ;;  %v1198_v27 = vpop.f32.mrf.mxu1 }
 0x21a   :  { %v690_v23 = vpop.f32.mrf.mxu0  ;;  %v760_v30 = vadd.f32 %v1198_v27, %v1883_v24 }
 0x21b   :  { %v1077_v2 = vpack.c.bf16 %v699_v61, %v696_v63  ;;  %v691_v25 = vadd.f32 %v1883_v24, %v690_v23  ;;  %v751_v41 = vpop.f32.mrf.mxu1 }
 0x21c   :  { %v752_v16 = vadd.f32 %v1883_v24, %v751_v41 }
 0x21d   :  { %1141 = vst [vmem:[#allocation2 + $0x18] sm:$0xff] %v1077_v2   ;;  %v1072_v13 = vpack.c.bf16 %v691_v25, %v688_v0  ;;  %v1199_v15 = vpop.f32.mrf.mxu1 }
 0x21e   :  { %v763_v19 = vadd.f32 %v1199_v15, %v1883_v24 }
 0x21f   :  { %1140 = vst [vmem:[#allocation2 + $0x10] sm:$0xff] %v1072_v13   ;;  %v754_v32 = vpop.f32.mrf.mxu1 }
 0x220   :  { %v1117_v1 = vpack.c.bf16 %v763_v19, %v760_v30  ;;  %v755_v34 = vadd.f32 %v1883_v24, %v754_v32 }
 0x222   :  { %1149 = vst [vmem:[#allocation2 + $0x58] sm:$0xff] %v1117_v1   ;;  %v1112_v35 = vpack.c.bf16 %v755_v34, %v752_v16 }
 0x224   :  { %1148 = vst [vmem:[#allocation2 + $0x50] sm:$0xff] %v1112_v35   ;;  %v1186_v48 = vpop.f32.mrf.mxu0 }
 0x225   :  { %v712_v42 = vadd.f32 %v1186_v48, %v1883_v24 }
 0x226   :  { %v703_v22 = vpop.f32.mrf.mxu0 }
 0x227   :  { %v704_v29 = vadd.f32 %v1883_v24, %v703_v22 }
 0x228   :  { %v1187_v49 = vpop.f32.mrf.mxu0  ;;  %v1202_v38 = vpop.f32.mrf.mxu1 }
 0x229   :  { %v715_v20 = vadd.f32 %v1187_v49, %v1883_v24  ;;  %v776_v8 = vadd.f32 %v1202_v38, %v1883_v24 }
 0x22a   :  { %v706_v5 = vpop.f32.mrf.mxu0  ;;  %v767_v46 = vpop.f32.mrf.mxu1 }
 0x22b   :  { %v1087_v36 = vpack.c.bf16 %v715_v20, %v712_v42  ;;  %v707_v39 = vadd.f32 %v1883_v24, %v706_v5  ;;  %v768_v51 = vadd.f32 %v1883_v24, %v767_v46 }
 0x22c   :  { %v1203_v50 = vpop.f32.mrf.mxu1 }
 0x22d   :  { %1143 = vst [vmem:[#allocation2 + $0x28] sm:$0xff] %v1087_v36   ;;  %v1082_v17 = vpack.c.bf16 %v707_v39, %v704_v29  ;;  %v779_v31 = vadd.f32 %v1203_v50, %v1883_v24 }
 0x22e   :  { %v770_v55 = vpop.f32.mrf.mxu1 }
 0x22f   :  { %1142 = vst [vmem:[#allocation2 + $0x20] sm:$0xff] %v1082_v17   ;;  %v1127_v54 = vpack.c.bf16 %v779_v31, %v776_v8  ;;  %v771_v26 = vadd.f32 %v1883_v24, %v770_v55 }
 0x231   :  { %1151 = vst [vmem:[#allocation2 + $0x68] sm:$0xff] %v1127_v54   ;;  %v1122_v53 = vpack.c.bf16 %v771_v26, %v768_v51 }
 0x233   :  { %1150 = vst [vmem:[#allocation2 + $0x60] sm:$0xff] %v1122_v53  }
 0x234   :  { %v1190_v12 = vpop.f32.mrf.mxu0 }
 0x235   :  { %v728_v57 = vadd.f32 %v1190_v12, %v1883_v24 }
 0x236   :  { %v719_v43 = vpop.f32.mrf.mxu0 }
 0x237   :  { %v720_v33 = vadd.f32 %v1883_v24, %v719_v43 }
 0x238   :  { %v1191_v52 = vpop.f32.mrf.mxu0  ;;  %v1206_v58 = vpop.f32.mrf.mxu1 }
 0x239   :  { %v731_v62 = vadd.f32 %v1191_v52, %v1883_v24  ;;  %v792_v9 = vadd.f32 %v1206_v58, %v1883_v24 }
 0x23a   :  { %v722_v40 = vpop.f32.mrf.mxu0  ;;  %v783_v44 = vpop.f32.mrf.mxu1 }
 0x23b   :  { %v1097_v11 = vpack.c.bf16 %v731_v62, %v728_v57  ;;  %v723_v3 = vadd.f32 %v1883_v24, %v722_v40  ;;  %v784_v6 = vadd.f32 %v1883_v24, %v783_v44 }
 0x23c   :  { %v1207_v10 = vpop.f32.mrf.mxu1 }
 0x23d   :  { %1145 = vst [vmem:[#allocation2 + $0x38] sm:$0xff] %v1097_v11   ;;  %v1092_v47 = vpack.c.bf16 %v723_v3, %v720_v33  ;;  %v795_v4 = vadd.f32 %v1207_v10, %v1883_v24 }
 0x23e   :  { %v786_v21 = vpop.f32.mrf.mxu1 }
 0x23f   :  { %1144 = vst [vmem:[#allocation2 + $0x30] sm:$0xff] %v1092_v47   ;;  %v1137_v56 = vpack.c.bf16 %v795_v4, %v792_v9  ;;  %v787_v14 = vadd.f32 %v1883_v24, %v786_v21 }
 0x241   :  { %1153 = vst [vmem:[#allocation2 + $0x78] sm:$0xff] %v1137_v56   ;;  %v1132_v59 = vpack.c.bf16 %v787_v14, %v784_v6 }
 0x243   :  { %1152 = vst [vmem:[#allocation2 + $0x70] sm:$0xff] %v1132_v59  }
 0x244   :  { %1292 = shalt.err (!%p1289_p4)
}
 0x245   :  { %s1304_s15 = smov 64   ;;  %s1305_s16 = smov 4  }
 0x246   :  { %969 = dma.vmem_to_hbm [thread:$0]  %s964_s13, 2048, %s1925_s5, [#allocation3], %s1304_s15, %s1304_s15, %s1305_s16  }
 0x247   :  { %1301 = dma.done.wait [#allocation3], 2048  }
 0x248   :  { %1302 = vsyncadd [#allocation3], 4294965248 }
 0x249   :  { %973 = vsyncpa [#allocation3], 1 }

</bundles_post_ra>
